<compile_context>
chip_gen: v5e
topology: v5e:2x2
jax: 0.10.0
libtpu: 0.0.40
codegen_flags: <defaults>
</compile_context>

<pallas_src>
import functools

import jax
import jax.numpy as jnp
import numpy as np
from jax import lax
from jax.experimental import pallas as pl
from jax.experimental.pallas import tpu as pltpu

BN_EPS = 1e-5
L2_EPS = 1e-12


def _round_up(a, m):
    return ((a + m - 1) // m) * m


# --------------------------------------------------------------------------- #
# Kernel
# --------------------------------------------------------------------------- #
def _fc_net_kernel(x_ref, w_ref, v_ref, out_ref):
    """x_ref: (tm, f_in) | w_ref: (3, F, F) | v_ref: (8, F) | out_ref: (tm, f_out or F)."""
    f_in = x_ref.shape[-1]
    f_out = out_ref.shape[-1]

    x = x_ref[...]
    v = v_ref[...]                      # single (8, F) vector load; slice the value
    b0 = v[0:1, :]
    b1 = v[1:2, :]
    b2 = v[2:3, :]
    es = v[3:4, :]
    et = v[4:5, :]

    # hidden layer 0: Linear (BN folded into W/b) -> ReLU, K = true input width
    h = jnp.dot(x, w_ref[0, :f_in, :], preferred_element_type=jnp.float32) + b0
    h = jnp.maximum(h, 0.0)

    # hidden layer 1: Linear (BN folded) -> ReLU
    h = jnp.dot(h, w_ref[1], preferred_element_type=jnp.float32) + b1
    h = jnp.maximum(h, 0.0)

    # output 'Linear_layer' head (padded cols of W2/b2 are zero -> o[:, f_out:] = 0)
    o = jnp.dot(h, w_ref[2], preferred_element_type=jnp.float32) + b2

    # L2 normalize: o / max(||o||, eps) == o * rsqrt(max(sum(o*o), eps^2))
    sumsq = jnp.sum(o * o, axis=-1, keepdims=True)
    o = o * lax.rsqrt(jnp.maximum(sumsq, L2_EPS * L2_EPS))

    # extra_batch: BatchNorm1d(2*out_dim), eval mode, folded scale/shift
    o = o * es + et
    if f_out < o.shape[-1]:             # true-width output path
        o = o[:, :f_out]
    out_ref[...] = o


# --------------------------------------------------------------------------- #
# Host-side parameter folding / packing
# --------------------------------------------------------------------------- #
def _bn_fold(gamma, beta, running_mean, running_var, eps=BN_EPS):
    scale = gamma / jnp.sqrt(running_var + eps)
    shift = beta - running_mean * scale
    return scale, shift


def fold_and_pack_params(params):
    """Fold hidden-layer / extra BN into scale+shift and pack into 2 buffers."""
    s0, t0 = _bn_fold(*params["bn0"])
    s1, t1 = _bn_fold(*params["bn1"])
    es, et = _bn_fold(*params["bn_out"])

    w0 = params["w0"] * s0                      # (f_in, f_h0)
    b0 = params["b0"] * s0 + t0                 # (1, f_h0)
    w1 = params["w1"] * s1
    b1 = params["b1"] * s1 + t1
    w2, b2 = params["w2"], params["b2"]

    widths = [w0.shape[0], w0.shape[1], w1.shape[1], w2.shape[1]]
    f_pad = max(128, _round_up(max(widths), 128))

    def pad_mat(w):
        k, n = w.shape
        return jnp.pad(w, ((0, f_pad - k), (0, f_pad - n)))

    def pad_vec(v):
        v = v.reshape(1, -1)
        return jnp.pad(v, ((0, 0), (0, f_pad - v.shape[-1])))

    w_packed = jnp.stack([pad_mat(w0), pad_mat(w1), pad_mat(w2)])       # (3, F, F)
    v_packed = jnp.concatenate(
        [pad_vec(b0), pad_vec(b1), pad_vec(b2), pad_vec(es), pad_vec(et),
         jnp.zeros((3, f_pad), jnp.float32)], axis=0)                   # (8, F)
    return w_packed, v_packed


# --------------------------------------------------------------------------- #
# Wrapper
# --------------------------------------------------------------------------- #
@functools.partial(jax.jit, static_argnames=("f_out", "tm_max", "padded_out"))
def fc_net_no_out_forward(x, w_packed, v_packed, *, f_out, tm_max=4096,
                          padded_out=False):
    """x: (B, 2*in_dim) float32 -> (B, 2*out_dim) float32."""
    B, f_in = x.shape
    f_pad = w_packed.shape[-1]

    # x features padded only to an 8-sublane multiple, NOT to 128 lanes.
    f_in_pad = _round_up(f_in, 8)

    # Adaptive batch tiling: big tiles amortize ~0.35us/grid-step, even split
    # avoids garbage rows, and >=2 tiles for large batches lets v7x's two
    # TensorCores share the work via dimension_semantics=("parallel",).
    b_pad = _round_up(B, 8)
    n_tiles = max(-(-b_pad // tm_max), 2 if b_pad >= 256 else 1)
    tm = _round_up(-(-b_pad // n_tiles), 8)
    b_pad = _round_up(b_pad, tm)

    if (b_pad != B) or (f_in_pad != f_in):
        x = jnp.pad(x, ((0, b_pad - B), (0, f_in_pad - f_in)))

    out_w = f_pad if padded_out else f_out
    grid = (b_pad // tm,)
    flops = 2 * b_pad * f_pad * (f_in_pad + 2 * f_pad)
    bytes_acc = 4 * (b_pad * f_in_pad + w_packed.size + v_packed.size
                     + b_pad * out_w)

    out = pl.pallas_call(
        _fc_net_kernel,
        out_shape=jax.ShapeDtypeStruct((b_pad, out_w), jnp.float32),
        grid=grid,
        in_specs=[
            pl.BlockSpec((tm, f_in_pad), lambda i: (i, 0)),        # x: tiled batch
            pl.BlockSpec((3, f_pad, f_pad), lambda i: (0, 0, 0)),  # weights: resident
            pl.BlockSpec((8, f_pad), lambda i: (0, 0)),            # packed vectors
        ],
        out_specs=pl.BlockSpec((tm, out_w), lambda i: (i, 0)),
        compiler_params=pltpu.CompilerParams(
            dimension_semantics=("parallel",)),
        cost_estimate=pl.CostEstimate(
            flops=flops, transcendentals=b_pad, bytes_accessed=bytes_acc),
    )(x, w_packed, v_packed)

    if padded_out:
        return out[:B, :f_out]
    return out[:B] if b_pad != B else out


# --------------------------------------------------------------------------- #
# Parameter init matching the module's shapes (linear_layer_wrapper doubles dims)
# --------------------------------------------------------------------------- #
def make_params(key, in_dim, hidden_dims, out_dim):
    f_in = 2 * in_dim
    f_h0 = 2 * hidden_dims[0]
    f_h1 = 2 * hidden_dims[1]
    f_out = 2 * out_dim

    keys = jax.random.split(key, 9)

    def linear(kw, kb, fan_in, fan_out):
        bound = 1.0 / np.sqrt(fan_in)
        w = jax.random.uniform(kw, (fan_in, fan_out), jnp.float32, -bound, bound)
        b = jax.random.uniform(kb, (1, fan_out), jnp.float32, -bound, bound)
        return w, b

    # Non-identity BN statistics so the host-side folding is actually tested.
    # TODO(synk): training-mode BatchNorm (batch statistics / running-stat
    # updates) is not implemented; eval-mode folded scale/shift only.
    def bn_stats(k, n):
        kg, kb, km, kv = jax.random.split(k, 4)
        gamma = 0.5 + jax.random.uniform(kg, (1, n), jnp.float32)
        beta = 0.1 * jax.random.normal(kb, (1, n), jnp.float32)
        mean = 0.1 * jax.random.normal(km, (1, n), jnp.float32)
        var = 0.5 + jax.random.uniform(kv, (1, n), jnp.float32)
        return (gamma, beta, mean, var)

    w0, b0 = linear(keys[0], keys[1], f_in, f_h0)
    w1, b1 = linear(keys[2], keys[3], f_h0, f_h1)
    w2, b2 = linear(keys[4], keys[5], f_h1, f_out)

    return dict(w0=w0, b0=b0, bn0=bn_stats(keys[6], f_h0),
                w1=w1, b1=b1, bn1=bn_stats(keys[7], f_h1),
                w2=w2, b2=b2, bn_out=bn_stats(keys[8], f_out))


def reference_forward(x, p):
    """Pure-JAX reference using UNFOLDED BatchNorm (validates the folding too)."""
    def bn(z, stats):
        g, b, m, v = stats
        return (z - m) / jnp.sqrt(v + BN_EPS) * g + b

    h = jnp.maximum(bn(x @ p["w0"] + p["b0"], p["bn0"]), 0.0)
    h = jnp.maximum(bn(h @ p["w1"] + p["b1"], p["bn1"]), 0.0)
    o = h @ p["w2"] + p["b2"]
    o = o / jnp.maximum(jnp.sqrt(jnp.sum(o * o, -1, keepdims=True)), L2_EPS)
    return bn(o, p["bn_out"])


if __name__ == "__main__":
    # module config: in_dim=16, hidden_dims=[32, 32], out_dim=16 (real widths x2)
    in_dim, hidden_dims, out_dim = 16, [32, 32], 16
    batch = 8

    key = jax.random.PRNGKey(0)
    kx, kp = jax.random.split(key)
    params = make_params(kp, in_dim, hidden_dims, out_dim)

    # input to the module: (B, 2*in_dim) — the module's .squeeze() is identity here
    x = jax.random.normal(kx, (batch, 2 * in_dim), jnp.float32)

    w_packed, v_packed = fold_and_pack_params(params)
    ref = np.asarray(jax.block_until_ready(reference_forward(x, params)))

    # default path: true-width output (less HBM writeback, no feature slice)
    out = jax.block_until_ready(
        fc_net_no_out_forward(x, w_packed, v_packed, f_out=2 * out_dim))
    assert out.shape == (batch, 2 * out_dim)
    assert np.allclose(np.asarray(out), ref, atol=1e-5, rtol=1e-5)

    # padded 128-lane output slab variant (lane-dense unmasked stores; keep for v5e)
    out_p = jax.block_until_ready(
        fc_net_no_out_forward(x, w_packed, v_packed, f_out=2 * out_dim,
                              padded_out=True))
    assert out_p.shape == (batch, 2 * out_dim)
    assert np.allclose(np.asarray(out_p), ref, atol=1e-5, rtol=1e-5)

    print("KERNEL_OK")
</pallas_src>

<mosaic_0001>
module attributes {stable_mosaic.version = 11 : i64} {
  func.func @_fc_net_kernel(%arg0: i32, %arg1: memref<8x32xf32, #tpu.memory_space<vmem>>, %arg2: memref<3x128x128xf32, #tpu.memory_space<vmem>>, %arg3: memref<8x128xf32, #tpu.memory_space<vmem>>, %arg4: memref<8x32xf32, #tpu.memory_space<vmem>>) attributes {dimension_semantics = [#tpu.dimension_semantics<parallel>], iteration_bounds = array<i64: 1>, scalar_prefetch = 0 : i64, scratch_operands = 0 : i64, tpu.core_type = #tpu.core_type<tc>, window_params = [{transform_indices = @transform_0, window_bounds = array<i64: 8, 32>}, {pipeline_mode = #tpu.pipeline_mode<synchronous>, transform_indices = @transform_1, window_bounds = array<i64: 3, 128, 128>}, {pipeline_mode = #tpu.pipeline_mode<synchronous>, transform_indices = @transform_2, window_bounds = array<i64: 8, 128>}, {transform_indices = @transform_3, window_bounds = array<i64: 8, 32>}]} {
    %c0 = arith.constant 0 : index
    %c0_0 = arith.constant 0 : index
    %0 = vector.load %arg1[%c0, %c0_0] : memref<8x32xf32, #tpu.memory_space<vmem>>, vector<8x32xf32>
    %c0_1 = arith.constant 0 : index
    %c0_2 = arith.constant 0 : index
    %1 = vector.load %arg3[%c0_1, %c0_2] : memref<8x128xf32, #tpu.memory_space<vmem>>, vector<8x128xf32>
    %2 = vector.extract_strided_slice %1 {offsets = [0, 0], sizes = [1, 128], strides = [1, 1]} : vector<8x128xf32> to vector<1x128xf32>
    %3 = vector.extract_strided_slice %1 {offsets = [1, 0], sizes = [1, 128], strides = [1, 1]} : vector<8x128xf32> to vector<1x128xf32>
    %4 = vector.extract_strided_slice %1 {offsets = [2, 0], sizes = [1, 128], strides = [1, 1]} : vector<8x128xf32> to vector<1x128xf32>
    %5 = vector.extract_strided_slice %1 {offsets = [3, 0], sizes = [1, 128], strides = [1, 1]} : vector<8x128xf32> to vector<1x128xf32>
    %6 = vector.extract_strided_slice %1 {offsets = [4, 0], sizes = [1, 128], strides = [1, 1]} : vector<8x128xf32> to vector<1x128xf32>
    %c0_3 = arith.constant 0 : index
    %c0_4 = arith.constant 0 : index
    %c0_5 = arith.constant 0 : index
    %7 = vector.load %arg2[%c0_3, %c0_4, %c0_5] : memref<3x128x128xf32, #tpu.memory_space<vmem>>, vector<1x32x128xf32>
    %8 = vector.shape_cast %7 : vector<1x32x128xf32> to vector<32x128xf32>
    %cst = arith.constant dense<0.000000e+00> : vector<8x128xf32>
    %9 = tpu.matmul %0, %8, %cst {dimension_numbers = #tpu.dot_dimension_numbers<[1], [0], [0], [1], [0, 0, 1, 1], [], []>} : vector<8x32xf32>, vector<32x128xf32>, vector<8x128xf32> -> vector<8x128xf32>
    %10 = vector.broadcast %2 : vector<1x128xf32> to vector<8x128xf32>
    %11 = arith.addf %9, %10 : vector<8x128xf32>
    %cst_6 = arith.constant 0.000000e+00 : f32
    %12 = vector.broadcast %cst_6 : f32 to vector<8x128xf32>
    %13 = arith.maximumf %11, %12 : vector<8x128xf32>
    %c1 = arith.constant 1 : index
    %c0_7 = arith.constant 0 : index
    %c0_8 = arith.constant 0 : index
    %14 = vector.load %arg2[%c1, %c0_7, %c0_8] : memref<3x128x128xf32, #tpu.memory_space<vmem>>, vector<1x128x128xf32>
    %15 = vector.shape_cast %14 : vector<1x128x128xf32> to vector<128x128xf32>
    %cst_9 = arith.constant dense<0.000000e+00> : vector<8x128xf32>
    %16 = tpu.matmul %13, %15, %cst_9 {dimension_numbers = #tpu.dot_dimension_numbers<[1], [0], [0], [1], [0, 0, 1, 1], [], []>} : vector<8x128xf32>, vector<128x128xf32>, vector<8x128xf32> -> vector<8x128xf32>
    %17 = vector.broadcast %3 : vector<1x128xf32> to vector<8x128xf32>
    %18 = arith.addf %16, %17 : vector<8x128xf32>
    %cst_10 = arith.constant 0.000000e+00 : f32
    %19 = vector.broadcast %cst_10 : f32 to vector<8x128xf32>
    %20 = arith.maximumf %18, %19 : vector<8x128xf32>
    %c2 = arith.constant 2 : index
    %c0_11 = arith.constant 0 : index
    %c0_12 = arith.constant 0 : index
    %21 = vector.load %arg2[%c2, %c0_11, %c0_12] : memref<3x128x128xf32, #tpu.memory_space<vmem>>, vector<1x128x128xf32>
    %22 = vector.shape_cast %21 : vector<1x128x128xf32> to vector<128x128xf32>
    %cst_13 = arith.constant dense<0.000000e+00> : vector<8x128xf32>
    %23 = tpu.matmul %20, %22, %cst_13 {dimension_numbers = #tpu.dot_dimension_numbers<[1], [0], [0], [1], [0, 0, 1, 1], [], []>} : vector<8x128xf32>, vector<128x128xf32>, vector<8x128xf32> -> vector<8x128xf32>
    %24 = vector.broadcast %4 : vector<1x128xf32> to vector<8x128xf32>
    %25 = arith.addf %23, %24 : vector<8x128xf32>
    %26 = arith.mulf %25, %25 : vector<8x128xf32>
    %cst_14 = arith.constant dense<0.000000e+00> : vector<8xf32>
    %27 = vector.multi_reduction <add>, %26, %cst_14 [1] : vector<8x128xf32> to vector<8xf32>
    %28 = vector.shape_cast %27 : vector<8xf32> to vector<8x1xf32>
    %cst_15 = arith.constant 1.000000e-24 : f32
    %29 = vector.broadcast %cst_15 : f32 to vector<8x1xf32>
    %30 = arith.maximumf %28, %29 : vector<8x1xf32>
    %31 = math.rsqrt %30 : vector<8x1xf32>
    %32 = vector.broadcast %31 : vector<8x1xf32> to vector<8x128xf32>
    %33 = arith.mulf %25, %32 : vector<8x128xf32>
    %34 = vector.broadcast %5 : vector<1x128xf32> to vector<8x128xf32>
    %35 = arith.mulf %33, %34 : vector<8x128xf32>
    %36 = vector.broadcast %6 : vector<1x128xf32> to vector<8x128xf32>
    %37 = arith.addf %35, %36 : vector<8x128xf32>
    %38 = vector.extract_strided_slice %37 {offsets = [0, 0], sizes = [8, 32], strides = [1, 1]} : vector<8x128xf32> to vector<8x32xf32>
    %c0_16 = arith.constant 0 : index
    %c0_17 = arith.constant 0 : index
    %39 = vector.load %arg4[%c0_16, %c0_17] : memref<8x32xf32, #tpu.memory_space<vmem>>, vector<8x32xf32>
    tpu.vector_store %arg4[%c0_16, %c0_17], %38 {strides = array<i32>} : memref<8x32xf32, #tpu.memory_space<vmem>>, vector<8x32xf32>,
    return
  }
  func.func @transform_0(%arg0: i32) -> (i32, i32) {
    %c0_i32 = arith.constant 0 : i32
    %c0_i32_0 = arith.constant 0 : i32
    return %arg0, %c0_i32 : i32, i32
  }
  func.func @transform_1(%arg0: i32) -> (i32, i32, i32) {
    %c0_i32 = arith.constant 0 : i32
    %c0_i32_0 = arith.constant 0 : i32
    %c0_i32_1 = arith.constant 0 : i32
    %c0_i32_2 = arith.constant 0 : i32
    return %c0_i32, %c0_i32_0, %c0_i32_1 : i32, i32, i32
  }
  func.func @transform_2(%arg0: i32) -> (i32, i32) {
    %c0_i32 = arith.constant 0 : i32
    %c0_i32_0 = arith.constant 0 : i32
    %c0_i32_1 = arith.constant 0 : i32
    return %c0_i32, %c0_i32_0 : i32, i32
  }
  func.func @transform_3(%arg0: i32) -> (i32, i32) {
    %c0_i32 = arith.constant 0 : i32
    %c0_i32_0 = arith.constant 0 : i32
    return %arg0, %c0_i32 : i32, i32
  }
}

</mosaic_0001>

<bundles_post_ra>
// kernel: fc_net_no_out_forward.1
= control target key start
LH: loop header
LB: loop body
LE: loop exit
PB: predicated region body
PF: predicated region fallthrough
CT: control target
= control target key end

     0   :  { %8 = vsyncpa [#allocation3], 0  ;;  %s356_s0 = inlined_call_operand.hbm [shape: f32[8,32], index: 0, kind: input, shape index: {}]   ;;  %s357_s1 = inlined_call_operand.hbm [shape: f32[3,128,128], index: 1, kind: input, shape index: {}]   ;;  %s358_s2 = inlined_call_operand.hbm [shape: f32[8,128], index: 2, kind: input, shape index: {}]   ;;  %s359_s3 = inlined_call_operand.hbm [shape: f32[8,32], index: 3, kind: output, shape index: {}]  }
   0x1   :  { %9 = vsyncpa [#allocation6], 0  ;;  %s26_s14 = sshll.u32 %s357_s1, 4  ;;  %s27_s14 = int_to_ptr.hbm [resolvable:$true] %s26_s14 }
   0x2   :  { %10 = vsyncpa [#allocation4], 0  ;;  %s316_s15 = smov [#allocation5]   ;;  %s16_s19 = sshll.u32 %s356_s0, 4  ;;  %s17_s19 = int_to_ptr.hbm [resolvable:$true] %s16_s19 }
   0x3   :  { %s28_s16 = sshll.u32 %s316_s15, 4  ;;  %s317_s20 = smov 128   ;;  %s29_s16 = int_to_ptr.vmem [resolvable:$true] %s28_s16 }
   0x4   :  { %s318_s21 = smov 8   ;;  %s319_s22 = smov [#allocation2]  }
   0x5   :  { %34 = dma.hbm_to_vmem [thread:$0]  %s27_s14, 6144, %s29_s16, [#allocation6], %s317_s20, %s317_s20, %s318_s21  }
   0x6   :  { %s18_s23 = sshll.u32 %s319_s22, 4  ;;  %s40_s26 = sshll.u32 %s358_s2, 4  ;;  %s19_s23 = int_to_ptr.vmem [resolvable:$true] %s18_s23  ;;  %s41_s26 = int_to_ptr.hbm [resolvable:$true] %s40_s26 }
   0x7   :  { %21 = dma.hbm_to_vmem [thread:$0]  %s17_s19, 128, %s19_s23, [#allocation3]  }
   0x8   :  { %s320_s1 = smov [#allocation7]  }
   0x9   :  { %s42_s27 = sshll.u32 %s320_s1, 4  ;;  %s43_s27 = int_to_ptr.vmem [resolvable:$true] %s42_s27 }
   0xa   :  { %45 = dma.hbm_to_vmem [thread:$0]  %s41_s26, 128, %s43_s27, [#allocation6]  }
   0xb   :  { %310 = dma.done.wait [#allocation3], 128  }
   0xc   :  { %311 = vsyncadd [#allocation3], 4294967168 }
   0xd   :  { %312 = dma.done.wait [#allocation6], 6272  }
   0xe   :  { %313 = vsyncadd [#allocation6], 4294961024  ;;  %v63_v0 = vld [vmem:[#allocation5 + $0x18] sm:$0xff]  ;;  %v62_v1 = vld [vmem:[#allocation5 + $0x10] sm:$0xff]  ;;  %vm65_vm0 = vcmask 261120   ;;  %s321_s0 = smov [#allocation8]  }
   0xf   :  { %81 = vmatpush.msra.mxu0 %v63_v0  ;;  %v106_v2 = vld [vmem:[#allocation5 + $0xf8] sm:$0xff]  ;;  %v61_v3 = vld [vmem:[#allocation5 + $0x8] sm:$0xff]  ;;  %v105_v4 = vld [vmem:[#allocation5 + $0xf0] sm:$0xff]  ;;  %s192_s2 = sshll.u32 %s321_s0, 4  ;;  %s194_s30 = sshll.u32 %s359_s3, 4  ;;  %s193_s2 = int_to_ptr.vmem [resolvable:$true] %s192_s2  ;;  %s195_s30 = int_to_ptr.hbm [resolvable:$true] %s194_s30 }
  0x10   :  { %108 = vmatpush.msra.mxu1 %v106_v2  ;;  %v104_v5 = vld [vmem:[#allocation5 + $0xe8] sm:$0xff]  ;;  %v60_v6 = vld [vmem:[#allocation5] sm:$0xff]  ;;  %v58_v7 = vld [vmem:[#allocation2] sm:$0xff] }
  0x11   :  { %82 = vmatpush.msra.mxu0 %v62_v1  ;;  %v103_v8 = vld [vmem:[#allocation5 + $0xe0] sm:$0xff]  ;;  %v102_v9 = vld [vmem:[#allocation5 + $0xd8] sm:$0xff]  ;;  %v101_v10 = vld [vmem:[#allocation5 + $0xd0] sm:$0xff] }
  0x12   :  { %109 = vmatpush.msra.mxu1 %v105_v4  ;;  %v100_v11 = vld [vmem:[#allocation5 + $0xc8] sm:$0xff]  ;;  %v99_v12 = vld [vmem:[#allocation5 + $0xc0] sm:$0xff]  ;;  %v98_v13 = vld [vmem:[#allocation5 + $0xb8] sm:$0xff] }
  0x13   :  { %83 = vmatpush.msra.mxu0 %v61_v3  ;;  %v97_v14 = vld [vmem:[#allocation5 + $0xb0] sm:$0xff]  ;;  %v96_v15 = vld [vmem:[#allocation5 + $0xa8] sm:$0xff]  ;;  %v95_v16 = vld [vmem:[#allocation5 + $0xa0] sm:$0xff] }
  0x14   :  { %110 = vmatpush.msra.mxu1 %v104_v5  ;;  %v94_v17 = vld [vmem:[#allocation5 + $0x98] sm:$0xff]  ;;  %v93_v18 = vld [vmem:[#allocation5 + $0x90] sm:$0xff]  ;;  %v92_v19 = vld [vmem:[#allocation5 + $0x88] sm:$0xff] }
  0x15   :  { %84 = vmatpush.msra.mxu0 %v60_v6  ;;  %v91_v20 = vld [vmem:[#allocation5 + $0x80] sm:$0xff]  ;;  %v145_v21 = vld [vmem:[#allocation5 + $0x178] sm:$0xff]  ;;  %v144_v22 = vld [vmem:[#allocation5 + $0x170] sm:$0xff] }
  0x16   :  { %205 = vmatmul.msk.f32.vlgmr.msra.gmra.mxu0 %vm65_vm0, %v58_v7  ;;  %111 = vmatpush.msra.mxu1 %v103_v8  ;;  %v143_v23 = vld [vmem:[#allocation5 + $0x168] sm:$0xff]  ;;  %v142_v24 = vld [vmem:[#allocation5 + $0x160] sm:$0xff]  ;;  %v141_v25 = vld [vmem:[#allocation5 + $0x158] sm:$0xff] }
  0x17   :  { %147 = vmatpush.msra.mxu2 %v145_v21  ;;  %v140_v26 = vld [vmem:[#allocation5 + $0x150] sm:$0xff]  ;;  %v139_v27 = vld [vmem:[#allocation5 + $0x148] sm:$0xff]  ;;  %v138_v28 = vld [vmem:[#allocation5 + $0x140] sm:$0xff] }
  0x18   :  { %112 = vmatpush.msra.mxu1 %v102_v9  ;;  %v137_v29 = vld [vmem:[#allocation5 + $0x138] sm:$0xff]  ;;  %v136_v30 = vld [vmem:[#allocation5 + $0x130] sm:$0xff]  ;;  %v135_v31 = vld [vmem:[#allocation5 + $0x128] sm:$0xff] }
  0x19   :  { %148 = vmatpush.msra.mxu2 %v144_v22  ;;  %v134_v32 = vld [vmem:[#allocation5 + $0x120] sm:$0xff]  ;;  %v133_v34 = vld [vmem:[#allocation5 + $0x118] sm:$0xff]  ;;  %v132_v39 = vld [vmem:[#allocation5 + $0x110] sm:$0xff] }
  0x1a   :  { %113 = vmatpush.msra.mxu1 %v101_v10  ;;  %v59_v33 = vld [vmem:[#allocation7] sm:$0xff]  ;;  %v131_v40 = vld [vmem:[#allocation5 + $0x108] sm:$0xff] }
  0x1b   :  { %149 = vmatpush.msra.mxu2 %v143_v23  ;;  %v64_v35 = vperm.slane %v59_v33, 0  ;;  %v130_v41 = vld [vmem:[#allocation5 + $0x100] sm:$0xff]  ;;  %v107_v42 = vperm.slane %v59_v33, 1  ;;  %v146_v46 = vperm.slane %v59_v33, 2  ;;  %v182_v58 = vperm.slane %v59_v33, 3 }
  0x1c   :  { %114 = vmatpush.msra.mxu1 %v100_v11  ;;  %v184_v61 = vperm.slane %v59_v33, 4 }
  0x1d   :  { %150 = vmatpush.msra.mxu2 %v142_v24 }
  0x1e   :  { %115 = vmatpush.msra.mxu1 %v99_v12 }
  0x1f   :  { %151 = vmatpush.msra.mxu2 %v141_v25 }
  0x20   :  { %116 = vmatpush.msra.mxu1 %v98_v13 }
  0x21   :  { %152 = vmatpush.msra.mxu2 %v140_v26 }
  0x22   :  { %117 = vmatpush.msra.mxu1 %v97_v14 }
  0x23   :  { %153 = vmatpush.msra.mxu2 %v139_v27 }
  0x24   :  { %118 = vmatpush.msra.mxu1 %v96_v15 }
  0x25   :  { %154 = vmatpush.msra.mxu2 %v138_v28 }
  0x26   :  { %119 = vmatpush.msra.mxu1 %v95_v16 }
  0x27   :  { %155 = vmatpush.msra.mxu2 %v137_v29 }
  0x28   :  { %120 = vmatpush.msra.mxu1 %v94_v17 }
  0x29   :  { %156 = vmatpush.msra.mxu2 %v136_v30 }
  0x2a   :  { %121 = vmatpush.msra.mxu1 %v93_v18 }
  0x2b   :  { %157 = vmatpush.msra.mxu2 %v135_v31 }
  0x2c   :  { %122 = vmatpush.msra.mxu1 %v92_v19 }
  0x2d   :  { %158 = vmatpush.msra.mxu2 %v134_v32 }
  0x2e   :  { %123 = vmatpush.msra.mxu1 %v91_v20 }
  0x2f   :  { %159 = vmatpush.msra.mxu2 %v133_v34 }
  0x31   :  { %160 = vmatpush.msra.mxu2 %v132_v39 }
  0x33   :  { %161 = vmatpush.msra.mxu2 %v131_v40 }
  0x35   :  { %162 = vmatpush.msra.mxu2 %v130_v41 }
  0x93   :  { %v86_v36 = vpop.f32.mrf.mxu0 }
  0x94   :  { %v87_v37 = vadd.f32 %v86_v36, %v64_v35 }
  0x96   :  { %v89_v38 = vmax.f32 %v87_v37, 0.0 }
  0x98   :  { %124 = vmatmul.f32.vlgmr.msra.gmra.mxu1 %v89_v38 }
 0x115   :  { %v125_v43 = vpop.f32.mrf.mxu1 }
 0x116   :  { %v126_v44 = vadd.f32 %v125_v43, %v107_v42 }
 0x118   :  { %v128_v45 = vmax.f32 %v126_v44, 0.0 }
 0x11a   :  { %163 = vmatmul.f32.vlgmr.msra.gmra.mxu2 %v128_v45 }
 0x19d   :  { %v164_v47 = vpop.f32.mrf.mxu2 }
 0x19e   :  { %v165_v48 = vadd.f32 %v164_v47, %v146_v46 }
 0x1a0   :  { %v167_v49 = vmul.f32 %v165_v48, %v165_v48 }
 0x1a2   :  { %168 = vadd.xlane.f32.xlu0 %v167_v49 }
 0x215   :  { %v169_v50 = vpop.xlane.xlu0 %168 }
 0x216   :  { %v170_v51 = vmax.f32 %v169_v50, 1e-24 }
 0x218   :  { %212 = vrsqrt.f32 %v170_v51  ;;  %vm177_vm2 = vweird.f32 %v170_v51 }
 0x21e   :  { %v213_v52 = vpop.eup %212 }
 0x21f   :  { %v172_v53 = vmul.f32 %v213_v52, %v170_v51  ;;  %vm178_vm1 = vweird.f32 %v213_v52 }
 0x220   :  { %vm179_vm3 = vmor %vm177_vm2, %vm178_vm1 }
 0x221   :  { %v173_v54 = vmul.f32 %v213_v52, %v172_v53 }
 0x223   :  { %v174_v55 = vmul.f32 0.5, %v173_v54 }
 0x225   :  { %v175_v56 = vsub.f32 1.5, %v174_v55 }
 0x227   :  { %v176_v57 = vmul.f32 %v213_v52, %v175_v56 }
 0x229   :  { %v180_v59 = vsel %vm179_vm3, %v213_v52, %v176_v57 }
 0x22a   :  { %v181_v60 = vmul.f32 %v180_v59, %v165_v48 }
 0x22c   :  { %v183_v62 = vmul.f32 %v182_v58, %v181_v60 }
 0x22e   :  { %v185_v63 = vadd.f32 %v184_v61, %v183_v62 }
 0x230   :  { %186 = vst.msk [vmem:[#allocation8] sm:$0xff] %vm65_vm0, %v185_v63 }
 0x231   :  { %197 = dma.vmem_to_hbm [thread:$0]  %s193_s2, 128, %s195_s30, [#allocation4]  }
 0x232   :  { %314 = dma.done.wait [#allocation4], 128  }
 0x233   :  { %315 = vsyncadd [#allocation4], 4294967168 }
 0x234   :  { %202 = vsyncpa [#allocation3], 1 }
 0x235   :  { %203 = vsyncpa [#allocation6], 1 }
 0x236   :  { %204 = vsyncpa [#allocation4], 1 }

</bundles_post_ra>
